<compile_context>
chip_gen: v7x
topology: tpu7x:2x2x1
jax: 0.10.0
libtpu: 0.0.40
codegen_flags: <defaults>
</compile_context>

<pallas_src>
import functools

import jax
import jax.numpy as jnp
from jax.experimental import pallas as pl
from jax.experimental.pallas import tpu as pltpu


def _round_up(x, m):
    return (x + m - 1) // m * m


def _semmap_loss_kernel(pred_ref, gt_ref, mask_ref, loss_out, cnt_out,
                        loss_acc, cnt_acc, *, pix_total, needs_tail_mask):
    n = pl.program_id(1)
    t = pl.program_id(2)

    @pl.when(jnp.logical_and(n == 0, t == 0))
    def _init():
        loss_acc[...] = jnp.zeros_like(loss_acc)
        cnt_acc[...] = jnp.zeros_like(cnt_acc)

    logits = pred_ref[...].astype(jnp.float32)        # (1, C, T): classes on sublanes
    gt = gt_ref[...]                                  # (1, 1, T) int32
    w = mask_ref[...].astype(jnp.float32)             # (1, 1, T) float weights

    # numerically-stable log-softmax NLL:  lse(logits) - logits[gt]
    m = jnp.max(logits, axis=1, keepdims=True)                       # sublane reduce
    lse = m + jnp.log(jnp.sum(jnp.exp(logits - m), axis=1, keepdims=True))
    cls = jax.lax.broadcasted_iota(jnp.int32, logits.shape, 1)        # (1, C, T)
    picked = jnp.sum(jnp.where(cls == gt, logits, 0.0), axis=1, keepdims=True)
    nll = lse - picked                                                # (1, 1, T)

    loss_term = nll * w
    cnt_term = w
    if needs_tail_mask:
        # Ragged pixel range: lanes past the real pixel count carry garbage
        # (possibly NaN/Inf) - select, never multiply, so nothing propagates.
        s = pl.program_id(0)
        tile = logits.shape[-1]
        base = (s * pl.num_programs(2) + t) * tile
        lane = jax.lax.broadcasted_iota(jnp.int32, (1, 1, tile), 2)
        in_bounds = (base + lane) < pix_total
        loss_term = jnp.where(in_bounds, loss_term, 0.0)
        cnt_term = jnp.where(in_bounds, cnt_term, 0.0)

    # lane-wide VPU accumulate; the cross-lane reduce is deferred to finalize.
    loss_acc[...] += loss_term
    cnt_acc[...] += cnt_term

    @pl.when(jnp.logical_and(n == pl.num_programs(1) - 1,
                             t == pl.num_programs(2) - 1))
    def _finalize():
        loss_out[...] = jnp.sum(loss_acc[...]).reshape(1, 1, 1)
        cnt_out[...] = jnp.sum(cnt_acc[...]).reshape(1, 1, 1)


def semmap_loss(obj_gt, obj_pred, mask, *, tile_pix=2048, num_splits=2):
    """Masked cross-entropy loss (forward of SemmapLoss).

    obj_pred: (N, C, H, W) logits (any float dtype; kept native in HBM).
    obj_gt:   (N, H, W) integer class labels in [0, C).
    mask:     (N, H, W) weight/validity mask (bool or float, used as float).
    """
    N, C, H, W = obj_pred.shape
    P = H * W

    pred = obj_pred.reshape(N, C, P)                      # free view of NCHW
    gt = obj_gt.reshape(N, 1, P).astype(jnp.int32)
    w = mask.reshape(N, 1, P).astype(jnp.float32)

    # ---- tile sizing -----------------------------------------------------
    # Lane-dense pixel tiles (multiple of 128), capped so the double-buffered
    # (logits + labels + mask) blocks stay well inside the scoped VMEM budget
    # on every chip (v7x: 64 MiB physical / 32 MiB scoped default per TC).
    bytes_per_px = C * pred.dtype.itemsize + 4 + 4        # logits + i32 gt + f32 mask
    vmem_budget = 8 * 1024 * 1024                          # per buffered block set
    max_tile = max(128, (vmem_budget // (2 * bytes_per_px)) // 128 * 128)
    tile_pix = int(min(_round_up(max(min(tile_pix, max_tile), 128), 128),
                       _round_up(P, 128)))

    tiles_total = -(-P // tile_pix)
    num_splits = int(max(1, min(num_splits, tiles_total)))
    tiles_per_split = -(-tiles_total // num_splits)
    covered_px = num_splits * tiles_per_split * tile_pix
    needs_clamp = num_splits * tiles_per_split > tiles_total
    needs_tail_mask = covered_px > P
    last_blk = tiles_total - 1

    def px_block(s, n, t):
        blk = s * tiles_per_split + t
        if needs_clamp:
            blk = jnp.minimum(blk, last_blk)   # redundant tiles re-read last block
        return (n, 0, blk)

    grid = (num_splits, N, tiles_per_split)

    kernel = functools.partial(_semmap_loss_kernel,
                               pix_total=P,
                               needs_tail_mask=needs_tail_mask)

    loss_sums, cnt_sums = pl.pallas_call(
        kernel,
        out_shape=(
            jax.ShapeDtypeStruct((num_splits, 1, 1), jnp.float32),
            jax.ShapeDtypeStruct((num_splits, 1, 1), jnp.float32),
        ),
        grid_spec=pltpu.PrefetchScalarGridSpec(
            num_scalar_prefetch=0,
            grid=grid,
            in_specs=[
                pl.BlockSpec((1, C, tile_pix), px_block),   # classes on sublanes
                pl.BlockSpec((1, 1, tile_pix), px_block),   # labels, pixels on lanes
                pl.BlockSpec((1, 1, tile_pix), px_block),   # mask weights
            ],
            out_specs=[
                pl.BlockSpec((1, 1, 1), lambda s, n, t: (s, 0, 0)),
                pl.BlockSpec((1, 1, 1), lambda s, n, t: (s, 0, 0)),
            ],
            scratch_shapes=[
                pltpu.VMEM((1, 1, tile_pix), jnp.float32),  # masked-NLL partials
                pltpu.VMEM((1, 1, tile_pix), jnp.float32),  # mask-weight partials
            ],
        ),
        compiler_params=pltpu.CompilerParams(
            # Split axis parallel (both TCs on v7x; a serial loop on v5e/v6e);
            # per-image / per-tile reduction axes are serial.
            dimension_semantics=("parallel", "arbitrary", "arbitrary")),
    )(pred, gt, w)

    return jnp.sum(loss_sums) / jnp.sum(cnt_sums)


def semmap_loss_ref(obj_gt, obj_pred, mask):
    # pure-JAX reference mirroring the PyTorch module
    logp = jax.nn.log_softmax(obj_pred.astype(jnp.float32), axis=1)     # (N,C,H,W)
    nll = -jnp.take_along_axis(logp, obj_gt[:, None].astype(jnp.int32), axis=1)[:, 0]
    m = mask.astype(jnp.float32)
    return jnp.sum(nll * m) / jnp.sum(m)


def _check(obj_gt, obj_pred, mask, **kw):
    out = jax.block_until_ready(semmap_loss(obj_gt, obj_pred, mask, **kw))
    ref = semmap_loss_ref(obj_gt, obj_pred, mask)
    assert jnp.allclose(out, ref, rtol=1e-4, atol=1e-5), (out, ref)


if __name__ == "__main__":
    key = jax.random.PRNGKey(0)

    # 1) binary mask, pixel count an exact multiple of the tile width
    k1, k2, k3, key = jax.random.split(key, 4)
    N, C, H, W = 2, 4, 16, 16
    obj_pred = jax.random.normal(k1, (N, C, H, W), dtype=jnp.float32)
    obj_gt = jax.random.randint(k2, (N, H, W), 0, C, dtype=jnp.int32)
    mask = jax.random.uniform(k3, (N, H, W)) < 0.7
    _check(obj_gt, obj_pred, mask)

    # 2) fractional float mask + uneven tile split (exercises index clamping
    #    and the in-kernel tail mask without any out-of-bounds block reads)
    k1, k2, k3, key = jax.random.split(key, 4)
    N, C, H, W = 2, 4, 16, 24
    obj_pred = jax.random.normal(k1, (N, C, H, W), dtype=jnp.float32)
    obj_gt = jax.random.randint(k2, (N, H, W), 0, C, dtype=jnp.int32)
    mask = jax.random.uniform(k3, (N, H, W))
    _check(obj_gt, obj_pred, mask, tile_pix=128, num_splits=2)

    # 3) ragged pixel count (H*W not a multiple of 128) - boundary block is
    #    only partially valid; garbage lanes are selected away in-kernel.
    k1, k2, k3, key = jax.random.split(key, 4)
    N, C, H, W = 2, 4, 15, 15
    obj_pred = jax.random.normal(k1, (N, C, H, W), dtype=jnp.bfloat16)
    obj_gt = jax.random.randint(k2, (N, H, W), 0, C, dtype=jnp.int32)
    mask = jax.random.uniform(k3, (N, H, W)) < 0.5
    _check(obj_gt, obj_pred, mask)

    print("KERNEL_OK")
</pallas_src>

<mosaic_0001>
module attributes {stable_mosaic.version = 11 : i64} {
  func.func @_semmap_loss_kernel(%arg0: i32, %arg1: i32, %arg2: i32, %arg3: memref<1x4x256xf32, #tpu.memory_space<vmem>>, %arg4: memref<1x1x256xi32, #tpu.memory_space<vmem>>, %arg5: memref<1x1x256xf32, #tpu.memory_space<vmem>>, %arg6: memref<1x1x1xf32, #tpu.memory_space<vmem>>, %arg7: memref<1x1x1xf32, #tpu.memory_space<vmem>>, %arg8: memref<1x1x256xf32, #tpu.memory_space<vmem>>, %arg9: memref<1x1x256xf32, #tpu.memory_space<vmem>>) attributes {dimension_semantics = [#tpu.dimension_semantics<parallel>, #tpu.dimension_semantics<arbitrary>, #tpu.dimension_semantics<arbitrary>], iteration_bounds = array<i64: 1, 2, 1>, scalar_prefetch = 0 : i64, scratch_operands = 2 : i64, tpu.core_type = #tpu.core_type<tc>, window_params = [{transform_indices = @transform_0, window_bounds = array<i64: 1, 4, 256>}, {transform_indices = @transform_1, window_bounds = array<i64: 1, 1, 256>}, {transform_indices = @transform_2, window_bounds = array<i64: 1, 1, 256>}, {transform_indices = @transform_3, window_bounds = array<i64: 1, 1, 1>}, {transform_indices = @transform_4, window_bounds = array<i64: 1, 1, 1>}]} {
    %c0_i32 = arith.constant 0 : i32
    %0 = arith.cmpi eq, %arg1, %c0_i32 : i32
    %c0_i32_0 = arith.constant 0 : i32
    %1 = arith.cmpi eq, %arg2, %c0_i32_0 : i32
    %2 = arith.andi %0, %1 : i1
    %3 = arith.extui %2 : i1 to i32
    %c0_i32_1 = arith.constant 0 : i32
    %4 = arith.cmpi ne, %3, %c0_i32_1 : i32
    scf.if %4 {
      %cst_27 = arith.constant 0.000000e+00 : f32
      %37 = vector.broadcast %cst_27 : f32 to vector<1x1x256xf32>
      %c0_28 = arith.constant 0 : index
      %c0_29 = arith.constant 0 : index
      %c0_30 = arith.constant 0 : index
      %38 = vector.load %arg8[%c0_28, %c0_29, %c0_30] : memref<1x1x256xf32, #tpu.memory_space<vmem>>, vector<1x1x256xf32>
      tpu.vector_store %arg8[%c0_28, %c0_29, %c0_30], %37 {strides = array<i32>} : memref<1x1x256xf32, #tpu.memory_space<vmem>>, vector<1x1x256xf32>,
      %cst_31 = arith.constant 0.000000e+00 : f32
      %39 = vector.broadcast %cst_31 : f32 to vector<1x1x256xf32>
      %c0_32 = arith.constant 0 : index
      %c0_33 = arith.constant 0 : index
      %c0_34 = arith.constant 0 : index
      %40 = vector.load %arg9[%c0_32, %c0_33, %c0_34] : memref<1x1x256xf32, #tpu.memory_space<vmem>>, vector<1x1x256xf32>
      tpu.vector_store %arg9[%c0_32, %c0_33, %c0_34], %39 {strides = array<i32>} : memref<1x1x256xf32, #tpu.memory_space<vmem>>, vector<1x1x256xf32>,
    } else {
    }
    %c0 = arith.constant 0 : index
    %c0_2 = arith.constant 0 : index
    %c0_3 = arith.constant 0 : index
    %5 = vector.load %arg3[%c0, %c0_2, %c0_3] : memref<1x4x256xf32, #tpu.memory_space<vmem>>, vector<1x4x256xf32>
    %c0_4 = arith.constant 0 : index
    %c0_5 = arith.constant 0 : index
    %c0_6 = arith.constant 0 : index
    %6 = vector.load %arg4[%c0_4, %c0_5, %c0_6] : memref<1x1x256xi32, #tpu.memory_space<vmem>>, vector<1x1x256xi32>
    %c0_7 = arith.constant 0 : index
    %c0_8 = arith.constant 0 : index
    %c0_9 = arith.constant 0 : index
    %7 = vector.load %arg5[%c0_7, %c0_8, %c0_9] : memref<1x1x256xf32, #tpu.memory_space<vmem>>, vector<1x1x256xf32>
    %cst = arith.constant dense<0xFF800000> : vector<1x256xf32>
    %8 = vector.multi_reduction <maximumf>, %5, %cst [1] : vector<1x4x256xf32> to vector<1x256xf32>
    %9 = vector.shape_cast %8 : vector<1x256xf32> to vector<1x1x256xf32>
    %10 = vector.broadcast %9 : vector<1x1x256xf32> to vector<1x4x256xf32>
    %11 = arith.subf %5, %10 : vector<1x4x256xf32>
    %12 = math.exp %11 : vector<1x4x256xf32>
    %cst_10 = arith.constant dense<0.000000e+00> : vector<1x256xf32>
    %13 = vector.multi_reduction <add>, %12, %cst_10 [1] : vector<1x4x256xf32> to vector<1x256xf32>
    %14 = vector.shape_cast %13 : vector<1x256xf32> to vector<1x1x256xf32>
    %15 = math.log %14 : vector<1x1x256xf32>
    %16 = arith.addf %9, %15 : vector<1x1x256xf32>
    %17 = tpu.iota {dimensions = array<i32: 1>} : vector<1x4x256xi32>
    %18 = vector.broadcast %6 : vector<1x1x256xi32> to vector<1x4x256xi32>
    %19 = arith.cmpi eq, %17, %18 : vector<1x4x256xi32>
    %cst_11 = arith.constant 0.000000e+00 : f32
    %20 = vector.broadcast %cst_11 : f32 to vector<1x4x256xf32>
    %21 = arith.select %19, %5, %20 : vector<1x4x256xi1>, vector<1x4x256xf32>
    %cst_12 = arith.constant dense<0.000000e+00> : vector<1x256xf32>
    %22 = vector.multi_reduction <add>, %21, %cst_12 [1] : vector<1x4x256xf32> to vector<1x256xf32>
    %23 = vector.shape_cast %22 : vector<1x256xf32> to vector<1x1x256xf32>
    %24 = arith.subf %16, %23 : vector<1x1x256xf32>
    %25 = arith.mulf %24, %7 : vector<1x1x256xf32>
    %c0_13 = arith.constant 0 : index
    %c0_14 = arith.constant 0 : index
    %c0_15 = arith.constant 0 : index
    %26 = vector.load %arg8[%c0_13, %c0_14, %c0_15] : memref<1x1x256xf32, #tpu.memory_space<vmem>>, vector<1x1x256xf32>
    %27 = arith.addf %26, %25 : vector<1x1x256xf32>
    %c0_16 = arith.constant 0 : index
    %c0_17 = arith.constant 0 : index
    %c0_18 = arith.constant 0 : index
    %28 = vector.load %arg8[%c0_16, %c0_17, %c0_18] : memref<1x1x256xf32, #tpu.memory_space<vmem>>, vector<1x1x256xf32>
    tpu.vector_store %arg8[%c0_16, %c0_17, %c0_18], %27 {strides = array<i32>} : memref<1x1x256xf32, #tpu.memory_space<vmem>>, vector<1x1x256xf32>,
    %c0_19 = arith.constant 0 : index
    %c0_20 = arith.constant 0 : index
    %c0_21 = arith.constant 0 : index
    %29 = vector.load %arg9[%c0_19, %c0_20, %c0_21] : memref<1x1x256xf32, #tpu.memory_space<vmem>>, vector<1x1x256xf32>
    %30 = arith.addf %29, %7 : vector<1x1x256xf32>
    %c0_22 = arith.constant 0 : index
    %c0_23 = arith.constant 0 : index
    %c0_24 = arith.constant 0 : index
    %31 = vector.load %arg9[%c0_22, %c0_23, %c0_24] : memref<1x1x256xf32, #tpu.memory_space<vmem>>, vector<1x1x256xf32>
    tpu.vector_store %arg9[%c0_22, %c0_23, %c0_24], %30 {strides = array<i32>} : memref<1x1x256xf32, #tpu.memory_space<vmem>>, vector<1x1x256xf32>,
    %c1_i32 = arith.constant 1 : i32
    %32 = arith.cmpi eq, %arg1, %c1_i32 : i32
    %c0_i32_25 = arith.constant 0 : i32
    %33 = arith.cmpi eq, %arg2, %c0_i32_25 : i32
    %34 = arith.andi %32, %33 : i1
    %35 = arith.extui %34 : i1 to i32
    %c0_i32_26 = arith.constant 0 : i32
    %36 = arith.cmpi ne, %35, %c0_i32_26 : i32
    scf.if %36 {
      %c0_27 = arith.constant 0 : index
      %c0_28 = arith.constant 0 : index
      %c0_29 = arith.constant 0 : index
      %37 = vector.load %arg8[%c0_27, %c0_28, %c0_29] : memref<1x1x256xf32, #tpu.memory_space<vmem>>, vector<1x1x256xf32>
      %38 = vector.shape_cast %37 : vector<1x1x256xf32> to vector<1x1x1x256xf32>
      %cst_30 = arith.constant dense<0.000000e+00> : vector<1xf32>
      %39 = vector.multi_reduction <add>, %38, %cst_30 [1, 2, 3] : vector<1x1x1x256xf32> to vector<1xf32>
      %40 = vector.shape_cast %39 : vector<1xf32> to vector<1x1x1x1xf32>
      %41 = vector.extract %40[0, 0, 0, 0] : f32 from vector<1x1x1x1xf32>
      %42 = vector.broadcast %41 : f32 to vector<1x1x1xf32>
      %c0_31 = arith.constant 0 : index
      %c0_32 = arith.constant 0 : index
      %c0_33 = arith.constant 0 : index
      %43 = vector.load %arg6[%c0_31, %c0_32, %c0_33] : memref<1x1x1xf32, #tpu.memory_space<vmem>>, vector<1x1x1xf32>
      tpu.vector_store %arg6[%c0_31, %c0_32, %c0_33], %42 {strides = array<i32>} : memref<1x1x1xf32, #tpu.memory_space<vmem>>, vector<1x1x1xf32>,
      %c0_34 = arith.constant 0 : index
      %c0_35 = arith.constant 0 : index
      %c0_36 = arith.constant 0 : index
      %44 = vector.load %arg9[%c0_34, %c0_35, %c0_36] : memref<1x1x256xf32, #tpu.memory_space<vmem>>, vector<1x1x256xf32>
      %45 = vector.shape_cast %44 : vector<1x1x256xf32> to vector<1x1x1x256xf32>
      %cst_37 = arith.constant dense<0.000000e+00> : vector<1xf32>
      %46 = vector.multi_reduction <add>, %45, %cst_37 [1, 2, 3] : vector<1x1x1x256xf32> to vector<1xf32>
      %47 = vector.shape_cast %46 : vector<1xf32> to vector<1x1x1x1xf32>
      %48 = vector.extract %47[0, 0, 0, 0] : f32 from vector<1x1x1x1xf32>
      %49 = vector.broadcast %48 : f32 to vector<1x1x1xf32>
      %c0_38 = arith.constant 0 : index
      %c0_39 = arith.constant 0 : index
      %c0_40 = arith.constant 0 : index
      %50 = vector.load %arg7[%c0_38, %c0_39, %c0_40] : memref<1x1x1xf32, #tpu.memory_space<vmem>>, vector<1x1x1xf32>
      tpu.vector_store %arg7[%c0_38, %c0_39, %c0_40], %49 {strides = array<i32>} : memref<1x1x1xf32, #tpu.memory_space<vmem>>, vector<1x1x1xf32>,
    } else {
    }
    return
  }
  func.func @transform_0(%arg0: i32, %arg1: i32, %arg2: i32) -> (i32, i32, i32) {
    %c1_i32 = arith.constant 1 : i32
    %0 = arith.muli %arg0, %c1_i32 : i32
    %1 = arith.addi %0, %arg2 : i32
    %c0_i32 = arith.constant 0 : i32
    %c0_i32_0 = arith.constant 0 : i32
    return %arg1, %c0_i32, %1 : i32, i32, i32
  }
  func.func @transform_1(%arg0: i32, %arg1: i32, %arg2: i32) -> (i32, i32, i32) {
    %c1_i32 = arith.constant 1 : i32
    %0 = arith.muli %arg0, %c1_i32 : i32
    %1 = arith.addi %0, %arg2 : i32
    %c0_i32 = arith.constant 0 : i32
    %c0_i32_0 = arith.constant 0 : i32
    return %arg1, %c0_i32, %1 : i32, i32, i32
  }
  func.func @transform_2(%arg0: i32, %arg1: i32, %arg2: i32) -> (i32, i32, i32) {
    %c1_i32 = arith.constant 1 : i32
    %0 = arith.muli %arg0, %c1_i32 : i32
    %1 = arith.addi %0, %arg2 : i32
    %c0_i32 = arith.constant 0 : i32
    %c0_i32_0 = arith.constant 0 : i32
    return %arg1, %c0_i32, %1 : i32, i32, i32
  }
  func.func @transform_3(%arg0: i32, %arg1: i32, %arg2: i32) -> (i32, i32, i32) {
    %c0_i32 = arith.constant 0 : i32
    %c0_i32_0 = arith.constant 0 : i32
    %c0_i32_1 = arith.constant 0 : i32
    return %arg0, %c0_i32, %c0_i32_0 : i32, i32, i32
  }
  func.func @transform_4(%arg0: i32, %arg1: i32, %arg2: i32) -> (i32, i32, i32) {
    %c0_i32 = arith.constant 0 : i32
    %c0_i32_0 = arith.constant 0 : i32
    %c0_i32_1 = arith.constant 0 : i32
    return %arg0, %c0_i32, %c0_i32_0 : i32, i32, i32
  }
}

</mosaic_0001>

<bundles_post_ra>
// kernel: tpu_custom_call.1
= control target key start
LH: loop header
LB: loop body
LE: loop exit
PB: predicated region body
PF: predicated region fallthrough
CT: control target
= control target key end

     0   :  { %10 = vsyncpa [#allocation5], 0  ;;  %s1247_s0 = inlined_call_operand.hbm [shape: f32[2,4,256], index: 0, kind: input, shape index: {}]   ;;  %s1248_s1 = inlined_call_operand.hbm [shape: s32[2,1,256], index: 1, kind: input, shape index: {}]   ;;  %s1249_s2 = inlined_call_operand.vmem [shape: f32[2,1,256], index: 2, kind: input, shape index: {}]   ;;  %s1250_s3 = inlined_call_operand.hbm [shape: f32[1,1,1], index: 3, kind: output, shape index: {0}]   ;;  %s1251_s4 = inlined_call_operand.hbm [shape: f32[1,1,1], index: 4, kind: output, shape index: {1}]  }
   0x1   :  { %12 = vsyncpa [#allocation5 + $0x1], 0 }
   0x2   :  { %13 = vsyncpa [#allocation8], 0 }
   0x3   :  { %15 = vsyncpa [#allocation8 + $0x1], 0 }
   0x4   :  { %16 = vsyncpa [#allocation6], 0 }
   0x5   :  { %17 = vsyncpa [#allocation11], 0  ;;  %s983_s15 = smov 0   ;;  %s985_s16 = smov 0  }
   0x6   :  { %s987_s17 = smov 0   ;;  %s989_s18 = smov 0  }
   0x7   :  { %s991_s19 = smov 0   ;;  %s993_s20 = smov 0  }
   0x8 LB: > { %s664_s21 = sadd.s32 4294967295, %s950_s20   ;;  %s38_s22 = sadd.s32 1, %s946_s19  ;;  %s950_s20 = sphi %s993_s20, %s23_s20   ;;  %s946_s19 = sphi %s991_s19, %s1268_s19   ;;  %s942_s18 = sphi %s989_s18, %s1267_s18   ;;  %s938_s17 = sphi %s987_s17, %s1266_s17   ;;  %s934_s16 = sphi %s985_s16, %s1265_s16   ;;  %s930_s15 = sphi %s983_s15, %s1264_s15  }
   0x9   : > { %p40_p0 = scmp.ge.s32.totalorder %s38_s22, 2  ;;  %s53_s23 = sadd.s32 1, %s938_s17 }
   0xa   : > { %p60_p1 = scmp.ne.s32.totalorder %s938_s17, %s934_s16  ;;  %p61_p2 = scmp.eq.s32.totalorder %s950_s20, 0 }
   0xb   : > { %s1270_s22 = smov (%p40_p0, %s38_s22), 0  ;;  %p66_p4 = scmp.ne.s32.totalorder %s934_s16, %s930_s15 }
   0xc   : > { %p1019_p3 = por %p61_p2, %p60_p1  ;;  %s48_s25 = ssub.s32 %s946_s19, %s1270_s22 }
   0xd   : > { %p67_p5 = scmp.eq.s32.totalorder %s664_s21, 0  ;;  %p51_p6 = scmp.eq.s32.totalorder %s48_s25, 0 }
   0xe   : > { %p712_p8 = scmp.lt.s32.totalorder %s950_s20, 2  ;;  %s1037_s28 = sand.u32 1, %s938_s17  }
   0xf   : > { %p1028_p7 = por %p67_p5, %p66_p4  ;;  %s685_s29 = sshll.u32 %s946_s19, 7 }
  0x10   : > { %s1034_s27 = scalar_select %p51_p6, %s938_s17, %s53_s23  }
  0x11   : > { %s1254_s26 = scalar_select %p1028_p7, 1, 0 }
  0x12   : > { %s667_s30 = sshll.u32 %s1037_s28, 3  ;;  %s1044_s7 = scalar_lea.hbm %s1247_s0, %s685_s29 }
  0x13   : > { %s206_s8 = scalar_lea.vmem [#allocation4], %s667_s30  ;;  %p1048_p9 = pnand %p712_p8, %p1019_p3 }
  0x14   : > { %s217_s9 = sshll.u32 %s206_s8, 4  ;;  %s203_s11 = scalar_lea.sflag [#allocation5], %s1037_s28  ;;  %s1052_s9 = int_to_ptr.vmem [resolvable:$true] %s217_s9 }
  0x15   : > { %s776_s12 = scalar_lea.hbm %s1044_s7, 128  ;;  %p778_p13 = pneg %p1048_p9 }
  0x16   : > { %p777_p12 = scmp.ne.s32.totalorder %s1044_s7, %s776_s12  ;;  %s781_s15 = scalar_lea.hbm %s1247_s0, 256 }
  0x17   : > { %p782_p2 = scmp.lt.u32.totalorder %s1044_s7, %s1247_s0  ;;  %p783_p3 = scmp.lt.u32.totalorder %s781_s15, %s776_s12 }
  0x18   : > { %p779_p0 = pnand %p778_p13, %p777_p12  ;;  %p785_p5 = scmp.lt.u32.totalorder %s776_s12, %s1044_s7 }
  0x19   : > { %p784_p4 = por %p783_p3, %p782_p2 }
  0x1a   : > { %p780_p1 = pneg %p779_p0 }
  0x1b   : > { %p786_p6 = por %p785_p5, %p784_p4 }
  0x1d   : > { %p787_p8 = pnand %p786_p6, %p780_p1 }
  0x1f   : > { %790 = shalt.err (!%p787_p8)
}
  0x20   : > { %s791_s25 = scalar_lea.vmem %s1052_s9, 128  ;;  %s952_s29 = smov [#allocation4]  }
  0x21   : > { %p792_p12 = scmp.ne.s32.totalorder %s1052_s9, %s791_s25  ;;  %s796_s30 = sshll.u32 %s952_s29, 4  ;;  %s797_s30 = int_to_ptr.vmem [resolvable:$false] %s796_s30 }
  0x22   : > { %s798_s5 = scalar_lea.vmem %s797_s30, 256  ;;  %p799_p11 = scmp.lt.s32.totalorder %s1052_s9, %s797_s30 }
  0x23   : > { %p794_p0 = pnand %p792_p12, %p778_p13  ;;  %p800_p2 = scmp.lt.s32.totalorder %s798_s5, %s791_s25 }
  0x25   : > { %p795_p10 = pneg %p794_p0  ;;  %p801_p3 = por %p800_p2, %p799_p11 }
  0x27   : > { %p802_p4 = pnand %p801_p3, %p795_p10 }
  0x29   : > { %805 = shalt.err (!%p802_p4)
}
  0x2a   : > { %708 = dma.hbm_to_vmem [thread:$0]  (!%p1048_p9), %s1044_s7, 128, %s1052_s9, %s203_s11  }
  0x2b   : > { %p1256_p1 = scmp.lt.s32.totalorder %s950_s20, 3  ;;  %p1257_p5 = scmp.ge.s32.totalorder %s950_s20, 1 }
  0x2c   : > { %s670_s8 = sshll.u32 %s1037_s28, 1  ;;  %s686_s12 = sshll.u32 %s946_s19, 5 }
  0x2d   : > { %p1086_p6 = pnand %p1257_p5, %p1256_p1  ;;  %s1095_s15 = scalar_lea.hbm %s1248_s1, %s686_s12 }
  0x2e   : > { %s228_s23 = scalar_lea.vmem [#allocation7], %s670_s8  ;;  %s225_s7 = scalar_lea.sflag [#allocation8], %s1037_s28 }
  0x2f   : > { %s1258_s6 = scalar_select %p1086_p6, 1, 0 }
  0x30   : > { %s239_s24 = sshll.u32 %s228_s23, 4  ;;  %s806_s9 = scalar_lea.hbm %s1095_s15, 32  ;;  %s240_s24 = int_to_ptr.vmem [resolvable:$true] %s239_s24 }
  0x31   : > { %p807_p10 = scmp.ne.s32.totalorder %s1095_s15, %s806_s9  ;;  %s811_s29 = scalar_lea.hbm %s1248_s1, 64 }
  0x32   : > { %p812_p12 = scmp.lt.u32.totalorder %s1095_s15, %s1248_s1  ;;  %p813_p0 = scmp.lt.u32.totalorder %s811_s29, %s806_s9 }
  0x33   : > { %p809_p11 = pnand %p807_p10, %p778_p13  ;;  %p815_p3 = scmp.lt.u32.totalorder %s806_s9, %s1095_s15 }
  0x34   : > { %p814_p2 = por %p813_p0, %p812_p12 }
  0x35   : > { %p810_p8 = pneg %p809_p11 }
  0x36   : > { %p816_p4 = por %p815_p3, %p814_p2 }
  0x38   : > { %p817_p1 = pnand %p816_p4, %p810_p8 }
  0x3a   : > { %820 = shalt.err (!%p817_p1)
}
  0x3b   : > { %s821_s28 = scalar_lea.vmem %s240_s24, 32  ;;  %s953_s8 = smov [#allocation7]  }
  0x3c   : > { %p822_p5 = scmp.ne.s32.totalorder %s240_s24, %s821_s28  ;;  %s826_s12 = sshll.u32 %s953_s8, 4  ;;  %s827_s12 = int_to_ptr.vmem [resolvable:$false] %s826_s12 }
  0x3d   : > { %s828_s13 = scalar_lea.vmem %s827_s12, 64  ;;  %p829_p7 = scmp.lt.s32.totalorder %s240_s24, %s827_s12 }
  0x3e   : > { %p824_p10 = pnand %p822_p5, %p778_p13  ;;  %p830_p6 = scmp.lt.s32.totalorder %s828_s13, %s821_s28 }
  0x40   : > { %p825_p11 = pneg %p824_p10  ;;  %p831_p0 = por %p830_p6, %p829_p7 }
  0x42   : > { %p832_p12 = pnand %p831_p0, %p825_p11 }
  0x44   : > { %835 = shalt.err (!%p832_p12)
}
  0x45   : > { %711 = dma.hbm_to_vmem [thread:$0]  (!%p1048_p9), %s1095_s15, 32, %s240_s24, %s225_s7  }
  0x46   : > { %p1259_p8 = scmp.ne.s32.totalorder %s1258_s6, 0 }
  0x47   : > { %s264_s14 = sand.u32 (!%p1259_p8), 1, %s934_s16   ;;  %p1260_p13 = scmp.ne.s32.totalorder (!%p1259_p8), %s1254_s26, 0 }
  0x48   : > { %262 = sbr.rel (%p1259_p8) target bundleno = 439 (0x1b7), region = 32  ;;  %s674_s23 = sshll.u32 (!%p1259_p8), %s264_s14, 3 }
  0x49   : > { %s265_s9 = scalar_lea.sflag (!%p1259_p8), [#allocation5], %s264_s14  ;;  %s268_s11 = scalar_lea.vmem (!%p1259_p8), [#allocation4], %s674_s23 }
  0x4f   : > { %913 = dma.done.wait (%p1260_p13), %s265_s9, 128  }
  0x50   : > { %915 = vsyncadd (%p1260_p13), %s265_s9, 4294967168  ;;  %s675_s25 = sshll.u32 %s264_s14, 1  ;;  %s274_s29 = scalar_lea.sflag [#allocation8], %s264_s14 }
  0x51   : > { %s1124_s10 = scalar_lea.vmem [#allocation7], %s675_s25 }
  0x52   : > { %917 = dma.done.wait (%p1260_p13), %s274_s29, 32  }
  0x53   : > { %919 = vsyncadd (%p1260_p13), %s274_s29, 4294967264  ;;  %p317_p7 = scmp.lt.s32.totalorder %s942_s18, 1  ;;  %p326_p9 = scmp.eq.s32.totalorder %s942_s18, 0 }
  0x54   : > { %v332_v0 = vlaneseq (%p326_p9)  ;;  %v954_v1 = vmov (%p326_p9), 0.0  }
  0x55   : > { %s318_s6 = scalar_select %p317_p7, %s942_s18, 1 }
  0x56   : > { %331 = sbr.rel (!%p326_p9) target bundleno = 93 (0x5d), region = 44  ;;  %vm334_vm0 = vcmp.lt.s32.totalorder (%p326_p9), %v332_v0, 256 }
  0x57   : > { %s676_s15 = sshll.u32 %s318_s6, 1  ;;  %336 = vst.msk [vmem:[#allocation2] sm:$0x3] (%p326_p9), %vm334_vm0, %v954_v1  ;;  %337 = vst.msk [vmem:[#allocation3] sm:$0x3] (%p326_p9), %vm334_vm0, %v954_v1 }
  0x58   : > { %s323_s30 = scalar_lea.vmem %s1249_s2, %s676_s15 }
  0x5d PF: > { %v338_v2 = vld [vmem:[%s268_s11] sm:$0xff]  ;;  %vm344_vm1 = vcmask 1043456   ;;  %v389_v3 = vlaneseq  ;;  %p460_p6 = scmp.eq.s32.totalorder %s942_s18, 1  ;;  %v1138_v6 = vld [vmem:[%s323_s30] sm:$0x3] }
  0x5e   : > { %v342_v4 = vcombine.high %v338_v2, %v338_v2  ;;  %v345_v5 = vsel %vm344_vm1, %v338_v2, -inf  ;;  %v457_v9 = vld [vmem:[#allocation3] sm:$0x3]  ;;  %v339_v28 = vld [vmem:[%s1124_s10] sm:$0x3]  ;;  %vm477_vm5 = vcmask (%p460_p6), 1040384  }
  0x5f   : > { %v346_v7 = vrot.slane %v345_v5, 4  ;;  %vm1140_vm2 = vcmp.lt.s32.totalorder %v389_v3, 256  ;;  %v458_v11 = vadd.f32 %v457_v9, %v1138_v6  ;;  %v390_v24 = vshrl.u32 %v389_v3, 7 }
  0x60   : > { %v352_v10 = vsel %vm344_vm1, %v342_v4, -inf  ;;  %v955_v1 = vmov 1966171168   ;;  %vm491_vm6 = vcmask (%p460_p6), 0  }
  0x61   : > { %v347_v12 = vmax.f32 %v345_v5, %v346_v7  ;;  %v353_v13 = vrot.slane %v352_v10, 4  ;;  %459 = vst.msk [vmem:[#allocation3] sm:$0x3] %vm1140_vm2, %v458_v11  ;;  %v1148_v27 = vsub.s32 0, %v390_v24  ;;  %v1151_v29 = vsub.s32 1, %v390_v24 }
  0x63   : > { %v348_v14 = vrot.slane %v347_v12, 2  ;;  %v354_v15 = vmax.f32 %v352_v10, %v353_v13  ;;  %v394_v30 = vrot.slane %v339_v28, %v1148_v27  ;;  %v398_v31 = vrot.slane %v339_v28, %v1151_v29 }
  0x64   : > { %v423_v9 = vrot.slane %v1138_v6, %v1148_v27 }
  0x65   : > { %v349_v16 = vmax.f32 %v347_v12, %v348_v14  ;;  %v355_v17 = vrot.slane %v354_v15, 2  ;;  %vm399_vm3 = vcmp.eq.s32.totalorder %v390_v24, %v394_v30  ;;  %vm400_vm4 = vcmp.eq.s32.totalorder %v390_v24, %v398_v31 }
  0x66   : > { %v401_v32 = vsel %vm399_vm3, %v338_v2, 0.0  ;;  %v402_v36 = vsel %vm400_vm4, %v342_v4, 0.0  ;;  %v427_v12 = vrot.slane %v1138_v6, %v1151_v29 }
  0x67   : > { %v350_v18 = vrot.slane %v349_v16, 1  ;;  %v356_v19 = vmax.f32 %v354_v15, %v355_v17  ;;  %v403_v38 = vsel %vm344_vm1, %v401_v32, 0.0  ;;  %v410_v42 = vsel %vm344_vm1, %v402_v36, 0.0 }
  0x68   : > { %v404_v43 = vrot.slane %v403_v38, 4  ;;  %v411_v46 = vrot.slane %v410_v42, 4 }
  0x69   : > { %v351_v20 = vmax.f32 %v349_v16, %v350_v18  ;;  %v357_v21 = vrot.slane %v356_v19, 1 }
  0x6a   : > { %v405_v49 = vadd.f32 %v404_v43, %v403_v38  ;;  %v412_v52 = vadd.f32 %v411_v46, %v410_v42 }
  0x6b   : > { %v358_v22 = vmax.f32 %v356_v19, %v357_v21  ;;  %v432_v21 = vld [vmem:[#allocation2] sm:$0x3] }
  0x6c   : > { %v406_v55 = vrot.slane %v405_v49, 2  ;;  %v413_v57 = vrot.slane %v412_v52, 2 }
  0x6d   : > { %v361_v23 = vcombine.low %v351_v20, %v358_v22 }
  0x6e   : > { %v407_v58 = vadd.f32 %v406_v55, %v405_v49  ;;  %v414_v59 = vadd.f32 %v413_v57, %v412_v52 }
  0x6f   : > { %v363_v25 = vsub.f32 %v338_v2, %v361_v23  ;;  %v437_v2 = vunpack.c.l.s4 %v955_v1 }
  0x70   : > { %v408_v60 = vrot.slane %v407_v58, 1  ;;  %v415_v61 = vrot.slane %v414_v59, 1 }
  0x71   : > { %v364_v26 = vmul.f32 1.442695, %v363_v25  ;;  %v438_v13 = vunpack.c.0.s8 %v437_v2 }
  0x72   : > { %v409_v0 = vadd.f32 %v408_v60, %v407_v58  ;;  %v416_v7 = vadd.f32 %v415_v61, %v414_v59 }
  0x73   : > { %770 = vpow2.f32 %v364_v26  ;;  %v441_v17 = vsub.s32 %v438_v13, %v390_v24 }
  0x7d   : > { %v771_v33 = vpop.eup %770 }
  0x7e   : > { %v367_v34 = vcombine.high %v771_v33, %v771_v33  ;;  %v369_v35 = vsel %vm344_vm1, %v771_v33, 0.0 }
  0x7f   : > { %v370_v37 = vrot.slane %v369_v35, 4 }
  0x80   : > { %v376_v39 = vsel %vm344_vm1, %v367_v34, 0.0 }
  0x81   : > { %v371_v40 = vadd.f32 %v370_v37, %v369_v35  ;;  %v377_v41 = vrot.slane %v376_v39, 4 }
  0x83   : > { %v372_v44 = vrot.slane %v371_v40, 2  ;;  %v378_v45 = vadd.f32 %v377_v41, %v376_v39 }
  0x85   : > { %v373_v47 = vadd.f32 %v372_v44, %v371_v40  ;;  %v379_v48 = vrot.slane %v378_v45, 2 }
  0x87   : > { %v374_v50 = vrot.slane %v373_v47, 1  ;;  %v380_v51 = vadd.f32 %v379_v48, %v378_v45 }
  0x89   : > { %v375_v53 = vadd.f32 %v374_v50, %v373_v47  ;;  %v381_v54 = vrot.slane %v380_v51, 1 }
  0x8b   : > { %v382_v56 = vadd.f32 %v381_v54, %v380_v51  ;;  %772 = vlog2.f32 %v375_v53 }
  0x8d   : > { %774 = vlog2.f32 %v382_v56 }
  0x95   : > { %v773_v62 = vpop.eup %772 }
  0x96   : > { %v384_v63 = vmul.f32 0.6931472, %v773_v62 }
  0x97   : > { %v775_v3 = vpop.eup %774 }
  0x98   : > { %v386_v4 = vmul.f32 0.6931472, %v775_v3  ;;  %v387_v5 = vadd.f32 %v384_v63, %v351_v20 }
  0x9a   : > { %v388_v10 = vadd.f32 %v386_v4, %v358_v22  ;;  %v417_v11 = vsub.f32 %v387_v5, %v409_v0  ;;  %v493_v22 = vld [vmem:[#allocation3] sm:$0x3] (%p460_p6) }
  0x9b   : > { %v498_v24 = vrot.slane (%p460_p6), %v493_v22, %v1148_v27  ;;  %v502_v28 = vrot.slane (%p460_p6), %v493_v22, %v1151_v29 }
  0x9c   : > { %v418_v14 = vsub.f32 %v388_v10, %v416_v7  ;;  %v430_v15 = vmul.f32 %v423_v9, %v417_v11 }
  0x9d   : > { %v505_v32 = vsel (%p460_p6), %vm477_vm5, %v498_v24, 0.0  ;;  %v506_v33 = vsel (%p460_p6), %vm477_vm5, %v502_v28, 0.0 }
  0x9e   : > { %v431_v16 = vmul.f32 %v427_v12, %v418_v14  ;;  %v507_v34 = vadd.f32 (%p460_p6), %v506_v33, %v505_v32 }
  0xa0   : > { %v435_v18 = vcombine.low %v430_v15, %v431_v16 }
  0xa2   : > { %v442_v19 = vrot.slane %v435_v18, %v441_v17  ;;  %464 = sbr.rel (!%p460_p6) target bundleno = 391 (0x187), region = 48 }
  0xa4   : > { %v449_v23 = vrot.slane %v442_v19, %v441_v17 }
  0xa6   : > { %v451_v25 = vadd.f32 %v449_v23, %v432_v21 }
  0xa8   : > { %456 = vst.msk [vmem:[#allocation2] sm:$0x3] %vm1140_vm2, %v451_v25 }
  0xaf   : > { %v465_v20 = vld [vmem:[#allocation2] sm:$0x3] }
  0xb0   : > { %v470_v6 = vrot.slane %v465_v20, %v1148_v27  ;;  %v474_v26 = vrot.slane %v465_v20, %v1151_v29 }
  0xb2   : > { %v478_v30 = vsel %vm477_vm5, %v470_v6, 0.0  ;;  %v479_v31 = vsel %vm477_vm5, %v474_v26, 0.0 }
  0xb3   : > { %v480_v8 = vadd.f32 %v479_v31, %v478_v30 }
  0xb5   : > { %481 = vadd.xlane.f32.xlu0 %v480_v8 }
  0xb9   : > { %508 = vadd.xlane.f32.xlu0 %v507_v34 }
 0x142   : > { %v482_v35 = vpop.xlane.xlu0 %481 }
 0x143   : > { %v483_v36 = vrot.slane %v482_v35, 4 }
 0x145   : > { %v484_v37 = vadd.f32 %v483_v36, %v482_v35 }
 0x146   : > { %v509_v38 = vpop.xlane.xlu0 %508 }
 0x147   : > { %v485_v39 = vrot.slane %v484_v37, 2  ;;  %v510_v40 = vrot.slane %v509_v38, 4 }
 0x149   : > { %v511_v41 = vadd.f32 %v510_v40, %v509_v38  ;;  %v486_v42 = vadd.f32 %v485_v39, %v484_v37 }
 0x14b   : > { %v512_v43 = vrot.slane %v511_v41, 2  ;;  %v487_v27 = vrot.slane %v486_v42, 1 }
 0x14d   : > { %v513_v44 = vadd.f32 %v512_v43, %v511_v41  ;;  %v488_v29 = vadd.f32 %v487_v27, %v486_v42 }
 0x14f   : > { %689 = vpush %v488_v29  ;;  %v514_v45 = vrot.slane %v513_v44, 1 }
 0x151   : > { %v515_v46 = vadd.f32 %v514_v45, %v513_v44 }
 0x153   : > { %691 = vpush %v515_v46 }
 0x180   : > { %s690_s18 = spop %689 }
 0x181   : > { %v490_v47 = vstv %s690_s18 }
 0x182   : > { %492 = vst.msk [vmem:[#allocation9] sm:$0x1] %vm491_vm6, %v490_v47 }
 0x184   : > { %s692_s26 = spop %691 }
 0x185   : > { %v517_v48 = vstv %s692_s26 }
 0x186   : > { %518 = vst.msk [vmem:[#allocation10] sm:$0x1] %vm491_vm6, %v517_v48 }
 0x187 PF: > { %p1173_p2 = scmp.eq.s32.totalorder %s664_s21, 1  ;;  %s956_s28 = smov [#allocation9]  }
 0x188   : > { %s528_s8 = sshll.u32 %s956_s28, 4  ;;  %s957_s12 = smov [#allocation10]   ;;  %s529_s8 = int_to_ptr.vmem [resolvable:$true] %s528_s8 }
 0x189   : > { %s541_s13 = sshll.u32 %s957_s12, 4  ;;  %s836_s14 = scalar_lea.vmem %s529_s8, 16  ;;  %s1177_s13 = int_to_ptr.vmem [resolvable:$true] %s541_s13 }
 0x18a   : > { %p837_p3 = scmp.ne.s32.totalorder %s529_s8, %s836_s14  ;;  %s842_s23 = scalar_lea.vmem %s529_s8, 32 }
 0x18b   : > { %p843_p5 = scmp.lt.s32.totalorder %s529_s8, %s529_s8  ;;  %p844_p10 = scmp.lt.s32.totalorder %s842_s23, %s836_s14 }
 0x18c   : > { %p838_p4 = pnand %p837_p3, %p1173_p2 }
 0x18d   : > { %p845_p11 = por %p844_p10, %p843_p5 }
 0x18e   : > { %p839_p1 = pneg %p838_p4 }
 0x190   : > { %p846_p0 = pnand %p845_p11, %p839_p1 }
 0x192   : > { %849 = shalt.err (!%p846_p0)
}
 0x193   : > { %s850_s11 = scalar_lea.hbm %s1250_s3, 16 }
 0x194   : > { %p851_p12 = scmp.ne.s32.totalorder %s1250_s3, %s850_s11  ;;  %p856_p7 = scmp.lt.u32.totalorder %s850_s11, %s1250_s3 }
 0x196   : > { %p852_p8 = pnand %p851_p12, %p1173_p2 }
 0x198   : > { %p853_p13 = pneg %p852_p8 }
 0x19a   : > { %p858_p9 = pnand %p856_p7, %p853_p13 }
 0x19c   : > { %861 = shalt.err (!%p858_p9)
}
 0x19d   : > { %698 = dma.vmem_to_hbm [thread:$0]  (%p1173_p2), %s529_s8, 16, %s1250_s3, [#allocation6]  }
 0x19e   : > { %s862_s7 = scalar_lea.vmem %s1177_s13, 16  ;;  %s868_s30 = scalar_lea.vmem %s1177_s13, 32 }
 0x19f   : > { %p863_p6 = scmp.ne.s32.totalorder %s1177_s13, %s862_s7  ;;  %p869_p1 = scmp.lt.s32.totalorder %s1177_s13, %s1177_s13 }
 0x1a0   : > { %p870_p5 = scmp.lt.s32.totalorder %s868_s30, %s862_s7 }
 0x1a1   : > { %p864_p3 = pnand %p863_p6, %p1173_p2 }
 0x1a2   : > { %p871_p10 = por %p870_p5, %p869_p1 }
 0x1a3   : > { %p865_p4 = pneg %p864_p3 }
 0x1a5   : > { %p872_p11 = pnand %p871_p10, %p865_p4 }
 0x1a7   : > { %875 = shalt.err (!%p872_p11)
}
 0x1a8   : > { %s876_s28 = scalar_lea.hbm %s1251_s4, 16 }
 0x1a9   : > { %p877_p0 = scmp.ne.s32.totalorder %s1251_s4, %s876_s28  ;;  %p882_p13 = scmp.lt.u32.totalorder %s876_s28, %s1251_s4 }
 0x1ab   : > { %p878_p12 = pnand %p877_p0, %p1173_p2 }
 0x1ad   : > { %p879_p8 = pneg %p878_p12 }
 0x1af   : > { %p884_p7 = pnand %p882_p13, %p879_p8 }
 0x1b1   : > { %887 = shalt.err (!%p884_p7)
}
 0x1b2   : > { %700 = dma.vmem_to_hbm [thread:$0]  (%p1173_p2), %s1177_s13, 16, %s1251_s4, [#allocation11]  }
 0x1b3   : > { %921 = dma.done.wait (%p1173_p2), [#allocation6], 16  }
 0x1b4   : > { %923 = vsyncadd (%p1173_p2), [#allocation6], 4294967280 }
 0x1b5   : > { %925 = dma.done.wait (%p1173_p2), [#allocation11], 16  }
 0x1b6   : > { %927 = vsyncadd (%p1173_p2), [#allocation11], 4294967280 }
 0x1b7 PF: > { %s23_s20 = sadd.s32 1, %s950_s20   ;;  %s1264_s15 = smov %s934_s16 }
 0x1b8   : > { %p20_p9 = scmp.ge.s32.totalorder %s23_s20, 4   ;;  %s1265_s16 = smov %s938_s17 }
 0x1b9   : > { %s1266_s17 = smov %s1034_s27  ;;  %s1267_s18 = smov %s946_s19 }
 0x1ba   : > { %s1268_s19 = smov %s1270_s22  ;;  %22 = sbr.rel (!%p20_p9) target bundleno = 8 (0x8), region = 103 }
 0x1c1   :  { %558 = vsyncpa [#allocation5], 1 }
 0x1c2   :  { %560 = vsyncpa [#allocation5 + $0x1], 1 }
 0x1c3   :  { %561 = vsyncpa [#allocation8], 1 }
 0x1c4   :  { %563 = vsyncpa [#allocation8 + $0x1], 1 }
 0x1c5   :  { %564 = vsyncpa [#allocation6], 1 }
 0x1c6   :  { %566 = vsyncpa [#allocation6 + $0x1], 1 }
 0x1c7   :  { %567 = vsyncpa [#allocation11], 1 }

</bundles_post_ra>
